<compile_context>
chip_gen: v5e
topology: v5e:2x2
jax: 0.10.0
libtpu: 0.0.40
codegen_flags: <defaults>
</compile_context>

<pallas_src>
import math

import jax
import jax.numpy as jnp
from jax.experimental import pallas as pl
from jax.experimental.pallas import tpu as pltpu

# ---- synthetic GPT2 config (small) ----
B = 2              # batch
S = 8              # sequence length
D = 32             # embedding dimension
NUM_HEADS = 4
HEAD_DIM = D // NUM_HEADS
FFN = 4 * D
EPS = 1e-5

# ---- packed small-parameter slab: one [16, 128] f32 array, one parameter
#      per row, every row starting at lane 0 (vreg-aligned extraction). ----
ROW_G1, ROW_B1, ROW_BO, ROW_G2, ROW_B2, ROW_BFC2 = 0, 1, 2, 3, 4, 5
ROW_BFC1 = 8                      # width FFN = 128 (full lane row)
SMALL_ROWS, SMALL_LANES = 16, 128

# Scores stay in f32; if the score dtype is ever lowered (bf16/f16), switch
# to a finfo-aware mask value.
MASK_VALUE = -1e30


def _layernorm_f32(h, g, b):
    mu = jnp.mean(h, axis=-1, keepdims=True)
    var = jnp.mean(jnp.square(h - mu), axis=-1, keepdims=True)
    return (h - mu) * jax.lax.rsqrt(var + EPS) * g + b


def gpt2_layer_kernel(x_ref, wqkv_ref, bqkv_ref, wo_ref, w1_ref, w2_ref,
                      small_ref, o_ref):
    x = x_ref[0]                                   # [S, D] f32 (one batch row)
    small = small_ref[...]                         # [16, 128] f32

    g1 = small[ROW_G1:ROW_G1 + 1, :D]
    b1 = small[ROW_B1:ROW_B1 + 1, :D]
    bo = small[ROW_BO:ROW_BO + 1, :D]
    g2 = small[ROW_G2:ROW_G2 + 1, :D]
    b2 = small[ROW_B2:ROW_B2 + 1, :D]
    bfc2 = small[ROW_BFC2:ROW_BFC2 + 1, :D]
    bfc1 = small[ROW_BFC1:ROW_BFC1 + 1, :FFN]

    # ---- LayerNorm 1 (f32) + head-major fused QKV projection (bf16 MXU) ----
    ln1 = _layernorm_f32(x, g1, b1)
    ln1_b = jnp.broadcast_to(ln1.astype(jnp.bfloat16), (3 * NUM_HEADS, S, D))
    # wqkv_ref: [3H, D, hd] bf16 with 1/sqrt(hd) folded into the Q group at
    # pack time; bqkv_ref: [3H, 1, hd] f32.
    qkv = jnp.einsum('nsd,ndk->nsk', ln1_b, wqkv_ref[...],
                     preferred_element_type=jnp.float32) + bqkv_ref[...]

    # Leading (major) axis slices only — no lane-axis head split, no stack.
    q = qkv[:NUM_HEADS]                            # [H, S, hd] (pre-scaled)
    k = qkv[NUM_HEADS:2 * NUM_HEADS]
    v = qkv[2 * NUM_HEADS:]

    # ---- causal attention, batched over heads (softmax in f32) ----
    s = jnp.einsum('hqd,hkd->hqk', q.astype(jnp.bfloat16),
                   k.astype(jnp.bfloat16),
                   preferred_element_type=jnp.float32)        # [H, S, S]
    row = jax.lax.broadcasted_iota(jnp.int32, (S, S), 0)
    col = jax.lax.broadcasted_iota(jnp.int32, (S, S), 1)
    s = jnp.where(row >= col, s, MASK_VALUE)
    m = jnp.max(s, axis=-1, keepdims=True)
    p = jnp.exp(s - m)
    l = jnp.sum(p, axis=-1, keepdims=True)
    ctx = jnp.einsum('hqk,hkd->hqd', p.astype(jnp.bfloat16),
                     v.astype(jnp.bfloat16),
                     preferred_element_type=jnp.float32)      # [H, S, hd]
    ctx = ctx * pl.reciprocal(l, approx=False)     # exact (per review)

    # ---- output projection folded per head (avoids a lane concatenate).
    # NOTE: at real sizes (H*hd >= 128 lanes) a single [S,D]x[D,D] matmul on
    # the lane-contiguous concat is preferable; at D=32 the folded form wins.
    proj = jnp.einsum('hqd,hdf->hqf', ctx.astype(jnp.bfloat16), wo_ref[...],
                      preferred_element_type=jnp.float32)     # [H, S, D]
    attn = jnp.sum(proj, axis=0) + bo                          # [S, D]
    # TODO(synk): attention / residual dropout omitted (eval mode => identity).
    h1 = x + attn

    # ---- LayerNorm 2 + MLP (tanh GELU); elementwise math kept in f32 ----
    ln2 = _layernorm_f32(h1, g2, b2)
    a = jnp.dot(ln2.astype(jnp.bfloat16), w1_ref[...],
                preferred_element_type=jnp.float32) + bfc1     # [S, FFN]
    c = math.sqrt(2.0 / math.pi)
    gelu = 0.5 * a * (1.0 + jnp.tanh(c * (a + 0.044715 * a * a * a)))
    mlp = jnp.dot(gelu.astype(jnp.bfloat16), w2_ref[...],
                  preferred_element_type=jnp.float32) + bfc2   # [S, D]

    # TODO(synk): D=32 < 128 lanes => masked store; becomes lane-dense
    # automatically once D is a multiple of 128 (real GPT-2 sizes).
    o_ref[0] = (h1 + mlp).astype(o_ref.dtype)


def pack_gpt2_params(params):
    """One-time packing into the kernel operand layout (NOT in the forward path)."""
    (g1, b1, wqkv, bqkv, wo, bo, g2, b2, w1, bfc1, w2, bfc2) = params
    scale = 1.0 / math.sqrt(HEAD_DIM)

    # Head-major QKV weight [3H, D, hd]; fold the attention scale into Q.
    wqkv_h = wqkv.reshape(D, 3, NUM_HEADS, HEAD_DIM).transpose(1, 2, 0, 3)
    wqkv_h = wqkv_h.at[0].multiply(scale)
    wqkv_h = wqkv_h.reshape(3 * NUM_HEADS, D, HEAD_DIM).astype(jnp.bfloat16)

    bqkv_h = bqkv.reshape(3, NUM_HEADS, HEAD_DIM)
    bqkv_h = bqkv_h.at[0].multiply(scale)
    bqkv_h = bqkv_h.reshape(3 * NUM_HEADS, 1, HEAD_DIM).astype(jnp.float32)

    wo_h = wo.reshape(NUM_HEADS, HEAD_DIM, D).astype(jnp.bfloat16)

    small = jnp.zeros((SMALL_ROWS, SMALL_LANES), jnp.float32)
    small = small.at[ROW_G1, :D].set(g1[0])
    small = small.at[ROW_B1, :D].set(b1[0])
    small = small.at[ROW_BO, :D].set(bo[0])
    small = small.at[ROW_G2, :D].set(g2[0])
    small = small.at[ROW_B2, :D].set(b2[0])
    small = small.at[ROW_BFC2, :D].set(bfc2[0])
    small = small.at[ROW_BFC1, :FFN].set(bfc1[0])

    return (wqkv_h, bqkv_h, wo_h,
            w1.astype(jnp.bfloat16), w2.astype(jnp.bfloat16), small)


def gpt2_layer_pallas(x, packed):
    wqkv_h, bqkv_h, wo_h, w1, w2, small = packed

    def const3(shape):
        return pl.BlockSpec(shape, lambda b: (0, 0, 0))

    def const2(shape):
        return pl.BlockSpec(shape, lambda b: (0, 0))

    return pl.pallas_call(
        gpt2_layer_kernel,
        grid=(B,),
        out_shape=jax.ShapeDtypeStruct((B, S, D), jnp.float32),
        in_specs=[
            pl.BlockSpec((1, S, D), lambda b: (b, 0, 0)),        # x (streamed)
            const3((3 * NUM_HEADS, D, HEAD_DIM)),                # wqkv (resident)
            const3((3 * NUM_HEADS, 1, HEAD_DIM)),                # bqkv
            const3((NUM_HEADS, HEAD_DIM, D)),                    # wo
            const2((D, FFN)),                                    # w1
            const2((FFN, D)),                                    # w2
            const2((SMALL_ROWS, SMALL_LANES)),                   # small params
        ],
        out_specs=pl.BlockSpec((1, S, D), lambda b: (b, 0, 0)),
        compiler_params=pltpu.CompilerParams(
            dimension_semantics=("parallel",)),                  # 2 TCs on v7x
    )(x, wqkv_h, bqkv_h, wo_h, w1, w2, small)


# ---------------- pure-JAX reference (for correctness check) ----------------
def gpt2_layer_ref(x, params):
    (g1, b1, wqkv, bqkv, wo, bo, g2, b2, w1, bfc1, w2, bfc2) = params

    def ln(h, g, b):
        mu = jnp.mean(h, axis=-1, keepdims=True)
        var = jnp.mean((h - mu) ** 2, axis=-1, keepdims=True)
        return (h - mu) / jnp.sqrt(var + EPS) * g[0] + b[0]

    l1 = ln(x, g1, b1)
    qkv = l1 @ wqkv + bqkv[0]
    q, k, v = jnp.split(qkv, 3, axis=-1)
    rh = lambda t: t.reshape(B, S, NUM_HEADS, HEAD_DIM).transpose(0, 2, 1, 3)
    q, k, v = rh(q), rh(k), rh(v)
    s = jnp.einsum("bhqd,bhkd->bhqk", q, k) / math.sqrt(HEAD_DIM)
    mask = jnp.tril(jnp.ones((S, S), dtype=bool))
    s = jnp.where(mask, s, -1e30)
    p = jax.nn.softmax(s, axis=-1)
    o = jnp.einsum("bhqk,bhkd->bhqd", p, v).transpose(0, 2, 1, 3).reshape(B, S, D)
    h1 = x + (o @ wo + bo[0])

    l2 = ln(h1, g2, b2)
    a = l2 @ w1 + bfc1[0]
    c = math.sqrt(2.0 / math.pi)
    gelu = 0.5 * a * (1.0 + jnp.tanh(c * (a + 0.044715 * a ** 3)))
    return h1 + (gelu @ w2 + bfc2[0])


def make_params(key):
    ks = jax.random.split(key, 12)
    std = 0.1
    g1 = jnp.ones((1, D), jnp.float32) + 0.02 * jax.random.normal(ks[0], (1, D))
    b1 = 0.02 * jax.random.normal(ks[1], (1, D), jnp.float32)
    wqkv = std * jax.random.normal(ks[2], (D, 3 * D), jnp.float32)
    bqkv = 0.05 * jax.random.normal(ks[3], (1, 3 * D), jnp.float32)
    wo = std * jax.random.normal(ks[4], (D, D), jnp.float32)
    bo = 0.05 * jax.random.normal(ks[5], (1, D), jnp.float32)
    g2 = jnp.ones((1, D), jnp.float32) + 0.02 * jax.random.normal(ks[6], (1, D))
    b2 = 0.02 * jax.random.normal(ks[7], (1, D), jnp.float32)
    w1 = std * jax.random.normal(ks[8], (D, FFN), jnp.float32)
    bfc1 = 0.05 * jax.random.normal(ks[9], (1, FFN), jnp.float32)
    w2 = std * jax.random.normal(ks[10], (FFN, D), jnp.float32)
    bfc2 = 0.05 * jax.random.normal(ks[11], (1, D), jnp.float32)
    return (g1, b1, wqkv, bqkv, wo, bo, g2, b2, w1, bfc1, w2, bfc2)


if __name__ == "__main__":
    key = jax.random.PRNGKey(0)
    kx, kp = jax.random.split(key)
    x = jax.random.normal(kx, (B, S, D), jnp.float32)
    params = make_params(kp)

    # One-time packing (kept out of the forward path, per review).
    packed = pack_gpt2_params(params)

    fwd = jax.jit(gpt2_layer_pallas)
    out = jax.block_until_ready(fwd(x, packed))
    ref = gpt2_layer_ref(x, params)

    assert out.shape == (B, S, D)
    # Tolerance covers the bf16 MXU operands (f32 accumulation everywhere).
    assert jnp.allclose(out, ref, atol=2e-2, rtol=2e-2), (
        f"max abs diff {jnp.max(jnp.abs(out - ref))}")
    print("KERNEL_OK")
</pallas_src>

<mosaic_0001>
module attributes {stable_mosaic.version = 11 : i64} {
  func.func @gpt2_layer_kernel(%arg0: i32, %arg1: memref<1x8x32xf32, #tpu.memory_space<vmem>>, %arg2: memref<12x32x8xbf16, #tpu.memory_space<vmem>>, %arg3: memref<12x1x8xf32, #tpu.memory_space<vmem>>, %arg4: memref<4x8x32xbf16, #tpu.memory_space<vmem>>, %arg5: memref<32x128xbf16, #tpu.memory_space<vmem>>, %arg6: memref<128x32xbf16, #tpu.memory_space<vmem>>, %arg7: memref<16x128xf32, #tpu.memory_space<vmem>>, %arg8: memref<1x8x32xf32, #tpu.memory_space<vmem>>) attributes {dimension_semantics = [#tpu.dimension_semantics<parallel>], iteration_bounds = array<i64: 2>, scalar_prefetch = 0 : i64, scratch_operands = 0 : i64, tpu.core_type = #tpu.core_type<tc>, window_params = [{transform_indices = @transform_0, window_bounds = array<i64: 1, 8, 32>}, {pipeline_mode = #tpu.pipeline_mode<synchronous>, transform_indices = @transform_1, window_bounds = array<i64: 12, 32, 8>}, {pipeline_mode = #tpu.pipeline_mode<synchronous>, transform_indices = @transform_2, window_bounds = array<i64: 12, 1, 8>}, {pipeline_mode = #tpu.pipeline_mode<synchronous>, transform_indices = @transform_3, window_bounds = array<i64: 4, 8, 32>}, {pipeline_mode = #tpu.pipeline_mode<synchronous>, transform_indices = @transform_4, window_bounds = array<i64: 32, 128>}, {pipeline_mode = #tpu.pipeline_mode<synchronous>, transform_indices = @transform_5, window_bounds = array<i64: 128, 32>}, {pipeline_mode = #tpu.pipeline_mode<synchronous>, transform_indices = @transform_6, window_bounds = array<i64: 16, 128>}, {transform_indices = @transform_7, window_bounds = array<i64: 1, 8, 32>}]} {
    %c0 = arith.constant 0 : index
    %c0_0 = arith.constant 0 : index
    %c0_1 = arith.constant 0 : index
    %0 = vector.load %arg1[%c0, %c0_0, %c0_1] : memref<1x8x32xf32, #tpu.memory_space<vmem>>, vector<1x8x32xf32>
    %1 = vector.shape_cast %0 : vector<1x8x32xf32> to vector<8x32xf32>
    %c0_2 = arith.constant 0 : index
    %c0_3 = arith.constant 0 : index
    %2 = vector.load %arg7[%c0_2, %c0_3] : memref<16x128xf32, #tpu.memory_space<vmem>>, vector<16x128xf32>
    %3 = vector.extract_strided_slice %2 {offsets = [0, 0], sizes = [1, 32], strides = [1, 1]} : vector<16x128xf32> to vector<1x32xf32>
    %4 = vector.extract_strided_slice %2 {offsets = [1, 0], sizes = [1, 32], strides = [1, 1]} : vector<16x128xf32> to vector<1x32xf32>
    %5 = vector.extract_strided_slice %2 {offsets = [2, 0], sizes = [1, 32], strides = [1, 1]} : vector<16x128xf32> to vector<1x32xf32>
    %6 = vector.extract_strided_slice %2 {offsets = [3, 0], sizes = [1, 32], strides = [1, 1]} : vector<16x128xf32> to vector<1x32xf32>
    %7 = vector.extract_strided_slice %2 {offsets = [4, 0], sizes = [1, 32], strides = [1, 1]} : vector<16x128xf32> to vector<1x32xf32>
    %8 = vector.extract_strided_slice %2 {offsets = [5, 0], sizes = [1, 32], strides = [1, 1]} : vector<16x128xf32> to vector<1x32xf32>
    %9 = vector.extract_strided_slice %2 {offsets = [8, 0], sizes = [1, 128], strides = [1, 1]} : vector<16x128xf32> to vector<1x128xf32>
    %cst = arith.constant dense<0.000000e+00> : vector<8xf32>
    %10 = vector.multi_reduction <add>, %1, %cst [1] : vector<8x32xf32> to vector<8xf32>
    %11 = vector.shape_cast %10 : vector<8xf32> to vector<8x1xf32>
    %cst_4 = arith.constant 3.200000e+01 : f32
    %12 = vector.broadcast %cst_4 : f32 to vector<8x1xf32>
    %13 = arith.divf %11, %12 : vector<8x1xf32>
    %14 = vector.broadcast %13 : vector<8x1xf32> to vector<8x32xf32>
    %15 = arith.subf %1, %14 : vector<8x32xf32>
    %16 = arith.mulf %15, %15 : vector<8x32xf32>
    %cst_5 = arith.constant dense<0.000000e+00> : vector<8xf32>
    %17 = vector.multi_reduction <add>, %16, %cst_5 [1] : vector<8x32xf32> to vector<8xf32>
    %18 = vector.shape_cast %17 : vector<8xf32> to vector<8x1xf32>
    %cst_6 = arith.constant 3.200000e+01 : f32
    %19 = vector.broadcast %cst_6 : f32 to vector<8x1xf32>
    %20 = arith.divf %18, %19 : vector<8x1xf32>
    %21 = vector.broadcast %13 : vector<8x1xf32> to vector<8x32xf32>
    %22 = arith.subf %1, %21 : vector<8x32xf32>
    %cst_7 = arith.constant 9.99999974E-6 : f32
    %23 = vector.broadcast %cst_7 : f32 to vector<8x1xf32>
    %24 = arith.addf %20, %23 : vector<8x1xf32>
    %25 = math.rsqrt %24 : vector<8x1xf32>
    %26 = vector.broadcast %25 : vector<8x1xf32> to vector<8x32xf32>
    %27 = arith.mulf %22, %26 : vector<8x32xf32>
    %28 = vector.broadcast %3 : vector<1x32xf32> to vector<8x32xf32>
    %29 = arith.mulf %27, %28 : vector<8x32xf32>
    %30 = vector.broadcast %4 : vector<1x32xf32> to vector<8x32xf32>
    %31 = arith.addf %29, %30 : vector<8x32xf32>
    %32 = arith.truncf %31 : vector<8x32xf32> to vector<8x32xbf16>
    %33 = vector.shape_cast %32 : vector<8x32xbf16> to vector<1x8x32xbf16>
    %34 = vector.broadcast %33 : vector<1x8x32xbf16> to vector<12x8x32xbf16>
    %c0_8 = arith.constant 0 : index
    %c0_9 = arith.constant 0 : index
    %c0_10 = arith.constant 0 : index
    %35 = vector.load %arg2[%c0_8, %c0_9, %c0_10] : memref<12x32x8xbf16, #tpu.memory_space<vmem>>, vector<12x32x8xbf16>
    "tpu.trace_start"() <{level = 10 : i32, message = "nsd,ndk->nsk"}> : () -> ()
    %cst_11 = arith.constant dense<0.000000e+00> : vector<12x8x8xf32>
    %36 = tpu.matmul %34, %35, %cst_11 {dimension_numbers = #tpu.dot_dimension_numbers<[2], [1], [1], [2], [0, 0, 0, 1, 1, 2], [0], [0]>} : vector<12x8x32xbf16>, vector<12x32x8xbf16>, vector<12x8x8xf32> -> vector<12x8x8xf32>
    "tpu.trace_stop"() : () -> ()
    %c0_12 = arith.constant 0 : index
    %c0_13 = arith.constant 0 : index
    %c0_14 = arith.constant 0 : index
    %37 = vector.load %arg3[%c0_12, %c0_13, %c0_14] : memref<12x1x8xf32, #tpu.memory_space<vmem>>, vector<12x1x8xf32>
    %38 = vector.broadcast %37 : vector<12x1x8xf32> to vector<12x8x8xf32>
    %39 = arith.addf %36, %38 : vector<12x8x8xf32>
    %40 = vector.extract_strided_slice %39 {offsets = [0, 0, 0], sizes = [4, 8, 8], strides = [1, 1, 1]} : vector<12x8x8xf32> to vector<4x8x8xf32>
    %41 = vector.extract_strided_slice %39 {offsets = [4, 0, 0], sizes = [4, 8, 8], strides = [1, 1, 1]} : vector<12x8x8xf32> to vector<4x8x8xf32>
    %42 = vector.extract_strided_slice %39 {offsets = [8, 0, 0], sizes = [4, 8, 8], strides = [1, 1, 1]} : vector<12x8x8xf32> to vector<4x8x8xf32>
    %43 = arith.truncf %40 : vector<4x8x8xf32> to vector<4x8x8xbf16>
    %44 = arith.truncf %41 : vector<4x8x8xf32> to vector<4x8x8xbf16>
    "tpu.trace_start"() <{level = 10 : i32, message = "hqd,hkd->hqk"}> : () -> ()
    %cst_15 = arith.constant dense<0.000000e+00> : vector<4x8x8xf32>
    %45 = tpu.matmul %43, %44, %cst_15 {dimension_numbers = #tpu.dot_dimension_numbers<[2], [2], [1], [1], [0, 0, 0, 1, 1, 1], [0], [0]>} : vector<4x8x8xbf16>, vector<4x8x8xbf16>, vector<4x8x8xf32> -> vector<4x8x8xf32>
    "tpu.trace_stop"() : () -> ()
    %46 = tpu.iota {dimensions = array<i32: 0>} : vector<8x8xi32>
    %47 = tpu.iota {dimensions = array<i32: 1>} : vector<8x8xi32>
    %48 = arith.cmpi sge, %46, %47 : vector<8x8xi32>
    %cst_16 = arith.constant -1.000000e+30 : f32
    %49 = vector.shape_cast %48 : vector<8x8xi1> to vector<1x8x8xi1>
    %50 = vector.broadcast %49 : vector<1x8x8xi1> to vector<4x8x8xi1>
    %51 = vector.broadcast %cst_16 : f32 to vector<4x8x8xf32>
    %52 = arith.select %50, %45, %51 : vector<4x8x8xi1>, vector<4x8x8xf32>
    %cst_17 = arith.constant dense<0xFF800000> : vector<4x8xf32>
    %53 = vector.multi_reduction <maximumf>, %52, %cst_17 [2] : vector<4x8x8xf32> to vector<4x8xf32>
    %54 = vector.shape_cast %53 : vector<4x8xf32> to vector<4x8x1xf32>
    %55 = vector.broadcast %54 : vector<4x8x1xf32> to vector<4x8x8xf32>
    %56 = arith.subf %52, %55 : vector<4x8x8xf32>
    %57 = math.exp %56 : vector<4x8x8xf32>
    %cst_18 = arith.constant dense<0.000000e+00> : vector<4x8xf32>
    %58 = vector.multi_reduction <add>, %57, %cst_18 [2] : vector<4x8x8xf32> to vector<4x8xf32>
    %59 = vector.shape_cast %58 : vector<4x8xf32> to vector<4x8x1xf32>
    %60 = arith.truncf %57 : vector<4x8x8xf32> to vector<4x8x8xbf16>
    %61 = arith.truncf %42 : vector<4x8x8xf32> to vector<4x8x8xbf16>
    "tpu.trace_start"() <{level = 10 : i32, message = "hqk,hkd->hqd"}> : () -> ()
    %cst_19 = arith.constant dense<0.000000e+00> : vector<4x8x8xf32>
    %62 = tpu.matmul %60, %61, %cst_19 {dimension_numbers = #tpu.dot_dimension_numbers<[2], [1], [1], [2], [0, 0, 0, 1, 1, 2], [0], [0]>} : vector<4x8x8xbf16>, vector<4x8x8xbf16>, vector<4x8x8xf32> -> vector<4x8x8xf32>
    "tpu.trace_stop"() : () -> ()
    %63 = tpu.reciprocal %59 : vector<4x8x1xf32> -> vector<4x8x1xf32>
    %64 = vector.broadcast %63 : vector<4x8x1xf32> to vector<4x8x8xf32>
    %65 = arith.mulf %62, %64 : vector<4x8x8xf32>
    %66 = arith.truncf %65 : vector<4x8x8xf32> to vector<4x8x8xbf16>
    %c0_20 = arith.constant 0 : index
    %c0_21 = arith.constant 0 : index
    %c0_22 = arith.constant 0 : index
    %67 = vector.load %arg4[%c0_20, %c0_21, %c0_22] : memref<4x8x32xbf16, #tpu.memory_space<vmem>>, vector<4x8x32xbf16>
    "tpu.trace_start"() <{level = 10 : i32, message = "hqd,hdf->hqf"}> : () -> ()
    %cst_23 = arith.constant dense<0.000000e+00> : vector<4x8x32xf32>
    %68 = tpu.matmul %66, %67, %cst_23 {dimension_numbers = #tpu.dot_dimension_numbers<[2], [1], [1], [2], [0, 0, 0, 1, 1, 2], [0], [0]>} : vector<4x8x8xbf16>, vector<4x8x32xbf16>, vector<4x8x32xf32> -> vector<4x8x32xf32>
    "tpu.trace_stop"() : () -> ()
    %cst_24 = arith.constant dense<0.000000e+00> : vector<8x32xf32>
    %69 = vector.multi_reduction <add>, %68, %cst_24 [0] : vector<4x8x32xf32> to vector<8x32xf32>
    %70 = vector.broadcast %5 : vector<1x32xf32> to vector<8x32xf32>
    %71 = arith.addf %69, %70 : vector<8x32xf32>
    %72 = arith.addf %1, %71 : vector<8x32xf32>
    %cst_25 = arith.constant dense<0.000000e+00> : vector<8xf32>
    %73 = vector.multi_reduction <add>, %72, %cst_25 [1] : vector<8x32xf32> to vector<8xf32>
    %74 = vector.shape_cast %73 : vector<8xf32> to vector<8x1xf32>
    %cst_26 = arith.constant 3.200000e+01 : f32
    %75 = vector.broadcast %cst_26 : f32 to vector<8x1xf32>
    %76 = arith.divf %74, %75 : vector<8x1xf32>
    %77 = vector.broadcast %76 : vector<8x1xf32> to vector<8x32xf32>
    %78 = arith.subf %72, %77 : vector<8x32xf32>
    %79 = arith.mulf %78, %78 : vector<8x32xf32>
    %cst_27 = arith.constant dense<0.000000e+00> : vector<8xf32>
    %80 = vector.multi_reduction <add>, %79, %cst_27 [1] : vector<8x32xf32> to vector<8xf32>
    %81 = vector.shape_cast %80 : vector<8xf32> to vector<8x1xf32>
    %cst_28 = arith.constant 3.200000e+01 : f32
    %82 = vector.broadcast %cst_28 : f32 to vector<8x1xf32>
    %83 = arith.divf %81, %82 : vector<8x1xf32>
    %84 = vector.broadcast %76 : vector<8x1xf32> to vector<8x32xf32>
    %85 = arith.subf %72, %84 : vector<8x32xf32>
    %cst_29 = arith.constant 9.99999974E-6 : f32
    %86 = vector.broadcast %cst_29 : f32 to vector<8x1xf32>
    %87 = arith.addf %83, %86 : vector<8x1xf32>
    %88 = math.rsqrt %87 : vector<8x1xf32>
    %89 = vector.broadcast %88 : vector<8x1xf32> to vector<8x32xf32>
    %90 = arith.mulf %85, %89 : vector<8x32xf32>
    %91 = vector.broadcast %6 : vector<1x32xf32> to vector<8x32xf32>
    %92 = arith.mulf %90, %91 : vector<8x32xf32>
    %93 = vector.broadcast %7 : vector<1x32xf32> to vector<8x32xf32>
    %94 = arith.addf %92, %93 : vector<8x32xf32>
    %95 = arith.truncf %94 : vector<8x32xf32> to vector<8x32xbf16>
    %c0_30 = arith.constant 0 : index
    %c0_31 = arith.constant 0 : index
    %96 = vector.load %arg5[%c0_30, %c0_31] : memref<32x128xbf16, #tpu.memory_space<vmem>>, vector<32x128xbf16>
    %cst_32 = arith.constant dense<0.000000e+00> : vector<8x128xf32>
    %97 = tpu.matmul %95, %96, %cst_32 {dimension_numbers = #tpu.dot_dimension_numbers<[1], [0], [0], [1], [0, 0, 1, 1], [], []>} : vector<8x32xbf16>, vector<32x128xbf16>, vector<8x128xf32> -> vector<8x128xf32>
    %98 = vector.broadcast %9 : vector<1x128xf32> to vector<8x128xf32>
    %99 = arith.addf %97, %98 : vector<8x128xf32>
    %cst_33 = arith.constant 5.000000e-01 : f32
    %100 = vector.broadcast %cst_33 : f32 to vector<8x128xf32>
    %101 = arith.mulf %100, %99 : vector<8x128xf32>
    %cst_34 = arith.constant 4.471500e-02 : f32
    %102 = vector.broadcast %cst_34 : f32 to vector<8x128xf32>
    %103 = arith.mulf %102, %99 : vector<8x128xf32>
    %104 = arith.mulf %103, %99 : vector<8x128xf32>
    %105 = arith.mulf %104, %99 : vector<8x128xf32>
    %106 = arith.addf %99, %105 : vector<8x128xf32>
    %cst_35 = arith.constant 0.797884583 : f32
    %107 = vector.broadcast %cst_35 : f32 to vector<8x128xf32>
    %108 = arith.mulf %107, %106 : vector<8x128xf32>
    %109 = math.tanh %108 : vector<8x128xf32>
    %cst_36 = arith.constant 1.000000e+00 : f32
    %110 = vector.broadcast %cst_36 : f32 to vector<8x128xf32>
    %111 = arith.addf %110, %109 : vector<8x128xf32>
    %112 = arith.mulf %101, %111 : vector<8x128xf32>
    %113 = arith.truncf %112 : vector<8x128xf32> to vector<8x128xbf16>
    %c0_37 = arith.constant 0 : index
    %c0_38 = arith.constant 0 : index
    %114 = vector.load %arg6[%c0_37, %c0_38] : memref<128x32xbf16, #tpu.memory_space<vmem>>, vector<128x32xbf16>
    %cst_39 = arith.constant dense<0.000000e+00> : vector<8x32xf32>
    %115 = tpu.matmul %113, %114, %cst_39 {dimension_numbers = #tpu.dot_dimension_numbers<[1], [0], [0], [1], [0, 0, 1, 1], [], []>} : vector<8x128xbf16>, vector<128x32xbf16>, vector<8x32xf32> -> vector<8x32xf32>
    %116 = vector.broadcast %8 : vector<1x32xf32> to vector<8x32xf32>
    %117 = arith.addf %115, %116 : vector<8x32xf32>
    %118 = arith.addf %72, %117 : vector<8x32xf32>
    %c0_40 = arith.constant 0 : index
    %c0_41 = arith.constant 0 : index
    %c0_42 = arith.constant 0 : index
    %119 = vector.load %arg8[%c0_40, %c0_41, %c0_42] : memref<1x8x32xf32, #tpu.memory_space<vmem>>, vector<1x8x32xf32>
    %120 = vector.shape_cast %119 : vector<1x8x32xf32> to vector<8x32xf32>
    %121 = vector.shape_cast %118 : vector<8x32xf32> to vector<1x8x32xf32>
    tpu.vector_store %arg8[%c0_40, %c0_41, %c0_42], %121 {strides = array<i32>} : memref<1x8x32xf32, #tpu.memory_space<vmem>>, vector<1x8x32xf32>,
    return
  }
  func.func @transform_0(%arg0: i32) -> (i32, i32, i32) {
    %c0_i32 = arith.constant 0 : i32
    %c0_i32_0 = arith.constant 0 : i32
    %c0_i32_1 = arith.constant 0 : i32
    return %arg0, %c0_i32, %c0_i32_0 : i32, i32, i32
  }
  func.func @transform_1(%arg0: i32) -> (i32, i32, i32) {
    %c0_i32 = arith.constant 0 : i32
    %c0_i32_0 = arith.constant 0 : i32
    %c0_i32_1 = arith.constant 0 : i32
    %c0_i32_2 = arith.constant 0 : i32
    return %c0_i32, %c0_i32_0, %c0_i32_1 : i32, i32, i32
  }
  func.func @transform_2(%arg0: i32) -> (i32, i32, i32) {
    %c0_i32 = arith.constant 0 : i32
    %c0_i32_0 = arith.constant 0 : i32
    %c0_i32_1 = arith.constant 0 : i32
    %c0_i32_2 = arith.constant 0 : i32
    return %c0_i32, %c0_i32_0, %c0_i32_1 : i32, i32, i32
  }
  func.func @transform_3(%arg0: i32) -> (i32, i32, i32) {
    %c0_i32 = arith.constant 0 : i32
    %c0_i32_0 = arith.constant 0 : i32
    %c0_i32_1 = arith.constant 0 : i32
    %c0_i32_2 = arith.constant 0 : i32
    return %c0_i32, %c0_i32_0, %c0_i32_1 : i32, i32, i32
  }
  func.func @transform_4(%arg0: i32) -> (i32, i32) {
    %c0_i32 = arith.constant 0 : i32
    %c0_i32_0 = arith.constant 0 : i32
    %c0_i32_1 = arith.constant 0 : i32
    return %c0_i32, %c0_i32_0 : i32, i32
  }
  func.func @transform_5(%arg0: i32) -> (i32, i32) {
    %c0_i32 = arith.constant 0 : i32
    %c0_i32_0 = arith.constant 0 : i32
    %c0_i32_1 = arith.constant 0 : i32
    return %c0_i32, %c0_i32_0 : i32, i32
  }
  func.func @transform_6(%arg0: i32) -> (i32, i32) {
    %c0_i32 = arith.constant 0 : i32
    %c0_i32_0 = arith.constant 0 : i32
    %c0_i32_1 = arith.constant 0 : i32
    return %c0_i32, %c0_i32_0 : i32, i32
  }
  func.func @transform_7(%arg0: i32) -> (i32, i32, i32) {
    %c0_i32 = arith.constant 0 : i32
    %c0_i32_0 = arith.constant 0 : i32
    %c0_i32_1 = arith.constant 0 : i32
    return %arg0, %c0_i32, %c0_i32_0 : i32, i32, i32
  }
}

</mosaic_0001>

<bundles_post_ra>
// kernel: gpt2_layer_pallas.1
= control target key start
LH: loop header
LB: loop body
LE: loop exit
PB: predicated region body
PF: predicated region fallthrough
CT: control target
= control target key end

     0   :  { %12 = vsyncpa [#allocation3], 0  ;;  %s2016_s0 = inlined_call_operand.vmem [shape: f32[2,8,32], index: 0, kind: input, shape index: {}]   ;;  %s2017_s1 = inlined_call_operand.vmem [shape: bf16[12,32,8], index: 1, kind: input, shape index: {}]   ;;  %s2018_s2 = inlined_call_operand.vmem [shape: f32[12,1,8], index: 2, kind: input, shape index: {}]   ;;  %s2019_s3 = inlined_call_operand.vmem [shape: bf16[4,8,32], index: 3, kind: input, shape index: {}]   ;;  %s2020_s4 = inlined_call_operand.vmem [shape: bf16[32,128], index: 4, kind: input, shape index: {}]   ;;  %s2021_s5 = inlined_call_operand.vmem [shape: bf16[128,32], index: 5, kind: input, shape index: {}]   ;;  %s2022_s6 = inlined_call_operand.vmem [shape: f32[16,128], index: 6, kind: input, shape index: {}]   ;;  %s2023_s7 = inlined_call_operand.hbm [shape: f32[2,8,32], index: 7, kind: output, shape index: {}]  }
   0x1   :  { %14 = vsyncpa [#allocation3 + $0x1], 0  ;;  %s1694_s24 = smov 0   ;;  %s1696_s25 = smov 0  }
   0x2   :  { %s1698_s26 = smov 0   ;;  %s1700_s27 = smov 0  }
   0x3 LB: > { %s1715_s28 = sadd.s32 4294967295, %s1651_s27   ;;  %s1308_s29 = sadd.s32 4294967294, %s1651_s27   ;;  %s1651_s27 = sphi %s1700_s27, %s2029_s27   ;;  %s1647_s26 = sphi %s1698_s26, %s2028_s26   ;;  %s1643_s25 = sphi %s1696_s25, %s2027_s25   ;;  %s1639_s24 = sphi %s1694_s24, %s2026_s24  }
   0x4   : > { %s1719_s30 = sadd.s32 1, %s1651_s27   ;;  %s179_s8 = sadd.s32 1, %s1647_s26 }
   0x5   : > { %s176_s9 = ssub.s32 %s1651_s27, %s1719_s30  ;;  %p189_p0 = scmp.ne.s32.totalorder %s1647_s26, %s1643_s25 }
   0x6   : > { %p177_p1 = scmp.eq.s32.totalorder %s176_s9, 0  ;;  %p190_p2 = scmp.eq.s32.totalorder %s1715_s28, 1 }
   0x7   : > { %p195_p3 = scmp.ne.s32.totalorder %s1643_s25, %s1639_s24  ;;  %p196_p4 = scmp.eq.s32.totalorder %s1308_s29, 1 }
   0x8   : > { %s1730_s10 = scalar_select %p177_p1, %s1647_s26, %s179_s8  }
   0x9   : > { %p1732_p5 = por %p190_p2, %p189_p0  ;;  %p1736_p6 = por %p196_p4, %p195_p3 }
   0xa   : > { %p1311_p7 = scmp.ge.s32.totalorder %s1651_s27, 1  ;;  %p239_p8 = scmp.lt.s32.totalorder %s1651_s27, 3 }
   0xc   : > { %p240_p9 = pnand %p1311_p7, %p239_p8 }
   0xd   : > { %p270_p10 = scmp.lt.s32.totalorder (!%p240_p9), %s1715_s28, 1  ;;  %s267_s29 = sand.u32 (!%p240_p9), 1, %s1643_s25  }
   0xe   : > { %243 = sbr.rel (%p240_p9) target bundleno = 1571 (0x623), region = 48  ;;  %s1312_s8 = sshll.u32 (!%p240_p9), %s267_s29, 3 }
   0xf   : > { %s1476_s9 = sshll.u32 (!%p240_p9), %s1715_s28, 3  ;;  %s269_s16 = scalar_lea.vmem (!%p240_p9), [#allocation2], %s1312_s8 }
  0x10   : > { %s1244_s15 = scalar_lea.hbm (!%p240_p9), %s2023_s7, %s1476_s9  ;;  %s1234_s19 = scalar_lea.sflag (!%p240_p9), [#allocation3], %s267_s29 }
  0x11   : > { %s1248_s18 = sshll.u32 (!%p240_p9), %s1244_s15, 4  ;;  %s1609_s23 = scalar_lea.hbm (!%p240_p9), %s2023_s7, 16  ;;  %s1249_s18 = int_to_ptr.hbm [resolvable:$true] %s1248_s18 }
  0x13   : > { %s271_s13 = scalar_select %p270_p10, %s1715_s28, 1  ;;  %vm278_vm0 = vcmask 261120   ;;  %v1653_v2 = vmov 32.0   ;;  %v1480_v14 = vld [vmem:[%s2017_s1 + $0x8] sm:$0xff]  ;;  %v1482_v15 = vld [vmem:[%s2017_s1 + $0x18] sm:$0xff]  ;;  %v1479_v18 = vld [vmem:[%s2017_s1] sm:$0xff] }
  0x14   : > { %1565 = vrcp.f32 %v1653_v2  ;;  %v1486_v16 = vld [vmem:[%s2017_s1 + $0x38] sm:$0xff]  ;;  %430 = vmatpush.bf16.msra.mxu0 %v1480_v14  ;;  %455 = vmatpush.bf16.msra.mxu2 %v1482_v15  ;;  %v1481_v19 = vld [vmem:[%s2017_s1 + $0x10] sm:$0xff]  ;;  %v1484_v23 = vld [vmem:[%s2017_s1 + $0x28] sm:$0xff]  ;;  %vm720_vm5 = vcmask 64512   ;;  %vm855_vm6 = vcmask 1043456   ;;  %s1603_s28 = sshra.s32 %s1249_s18, 4  ;;  %s1604_s28 = int_to_ptr.hbm [resolvable:$true] %s1603_s28 }
  0x15   : > { %s1313_s14 = sshll.u32 %s271_s13, 3  ;;  %v1490_v17 = vld [vmem:[%s2017_s1 + $0x58] sm:$0xff]  ;;  %505 = vmatpush.bf16.msra.mxu3 %v1486_v16  ;;  %v1485_v20 = vld [vmem:[%s2017_s1 + $0x30] sm:$0xff]  ;;  %v1488_v24 = vld [vmem:[%s2017_s1 + $0x48] sm:$0xff]  ;;  %s1605_s20 = scalar_lea.hbm %s1604_s28, 8 }
  0x16   : > { %s273_s17 = scalar_lea.vmem %s2016_s0, %s1313_s14  ;;  %555 = vmatpush.bf16.msra.mxu1 %v1490_v17  ;;  %v1489_v21 = vld [vmem:[%s2017_s1 + $0x50] sm:$0xff]  ;;  %v1494_v25 = vld [vmem:[%s2017_s1 + $0x78] sm:$0xff]  ;;  %v1483_v28 = vld [vmem:[%s2017_s1 + $0x20] sm:$0xff]  ;;  %p1606_p11 = scmp.ne.s32.totalorder %s1604_s28, %s1605_s20 }
  0x17   : > { %v1747_v0 = vld [vmem:[%s273_s17] sm:$0xff]  ;;  %v1498_v27 = vld [vmem:[%s2017_s1 + $0x98] sm:$0xff]  ;;  %v1493_v31 = vld [vmem:[%s2017_s1 + $0x70] sm:$0xff]  ;;  %s1246_s17 = sshll.u32 %s269_s16, 4  ;;  %p1610_p0 = scmp.lt.s32.totalorder %s1604_s28, %s2023_s7  ;;  %s1247_s17 = int_to_ptr.vmem [resolvable:$true] %s1246_s17 }
  0x18   : > { %v279_v1 = vsel %vm278_vm0, %v1747_v0, 0.0  ;;  %431 = vmatpush.bf16.msra.mxu0 %v1479_v18  ;;  %456 = vmatpush.bf16.msra.mxu2 %v1481_v19  ;;  %v1487_v29 = vld [vmem:[%s2017_s1 + $0x40] sm:$0xff]  ;;  %v1497_v32 = vld [vmem:[%s2017_s1 + $0x90] sm:$0xff]  ;;  %v1492_v47 = vld [vmem:[%s2017_s1 + $0x68] sm:$0xff]  ;;  %p1607_p12 = pnand %p1606_p11, %p1732_p5  ;;  %p1611_p1 = scmp.lt.s32.totalorder %s1609_s23, %s1605_s20 }
  0x19   : > { %280 = vadd.xlane.f32.xlu0 %v279_v1  ;;  %506 = vmatpush.bf16.msra.mxu3 %v1485_v20  ;;  %v1808_v37 = vld [vmem:[%s2022_s6] sm:$0xff]  ;;  %v1496_v48 = vld [vmem:[%s2017_s1 + $0x88] sm:$0xff]  ;;  %v1502_v49 = vld [vmem:[%s2017_s1 + $0xb8] sm:$0xff] }
  0x1a   : > { %v1566_v3 = vpop.eup %1565  ;;  %556 = vmatpush.bf16.msra.mxu1 %v1489_v21  ;;  %v308_v40 = vperm.slane %v1808_v37, 0  ;;  %v310_v42 = vperm.slane %v1808_v37, 1  ;;  %v1491_v50 = vld [vmem:[%s2017_s1 + $0x60] sm:$0xff]  ;;  %v1501_v52 = vld [vmem:[%s2017_s1 + $0xb0] sm:$0xff]  ;;  %v1500_v53 = vld [vmem:[%s2017_s1 + $0xa8] sm:$0xff]  ;;  %p1608_p13 = pneg %p1607_p12  ;;  %p1612_p2 = por %p1611_p1, %p1610_p0 }
  0x1b   : > { %v283_v4 = vmul.f32 32.0, %v1566_v3  ;;  %vm287_vm1 = vweird.f32 %v1566_v3  ;;  %v1495_v51 = vld [vmem:[%s2017_s1 + $0x80] sm:$0xff] }
  0x1c   : > { %480 = vmatpush.bf16.msrb.mxu2 %v1484_v23  ;;  %530 = vmatpush.bf16.msrb.mxu0 %v1488_v24  ;;  %v1499_v54 = vld [vmem:[%s2017_s1 + $0xa0] sm:$0xff]  ;;  %p1613_p3 = pnand %p1612_p2, %p1608_p13 }
  0x1d   : > { %v284_v5 = vsub.f32 1.0, %v283_v4  ;;  %605 = vmatpush.bf16.msrb.mxu3 %v1494_v25  ;;  %v1554_v55 = vld [vmem:[%s2018_s2 + $0x5] ss:$0 sm:$0xff]  ;;  %v1555_v60 = vld [vmem:[%s2018_s2 + $0x1] ss:$0 sm:$0xff] }
  0x1e   : > { %655 = vmatpush.bf16.msrb.mxu1 %v1498_v27  ;;  %v1553_v14 = vld [vmem:[%s2018_s2] ss:$0 sm:$0xff]  ;;  %v1560_v17 = vld [vmem:[%s2018_s2 + $0x7] ss:$0 sm:$0xff] }
  0x1f   : > { %v285_v6 = vmul.f32 %v1566_v3, %v284_v5  ;;  %v1557_v5 = vld [vmem:[%s2018_s2 + $0x4] ss:$0 sm:$0xff] }
  0x20   : > { %481 = vmatpush.bf16.msrb.mxu2 %v1483_v28  ;;  %531 = vmatpush.bf16.msrb.mxu0 %v1487_v29 }
  0x21   : > { %v286_v7 = vadd.f32 %v1566_v3, %v285_v6  ;;  %606 = vmatpush.bf16.msrb.mxu3 %v1493_v31 }
  0x22   : > { %656 = vmatpush.bf16.msrb.mxu1 %v1497_v32 }
  0x23   : > { %v1751_v8 = vsel %vm287_vm1, %v1566_v3, %v286_v7  ;;  %v1558_v7 = vld [vmem:[%s2018_s2 + $0x9] ss:$0 sm:$0xff] }
  0x8c   : > { %v281_v9 = vpop.xlane.xlu0 %280 }
  0x8d   : > { %v289_v10 = vmul.f32 %v1751_v8, %v281_v9 }
  0x8f   : > { %v290_v11 = vsub.f32 %v1747_v0, %v289_v10 }
  0x91   : > { %v291_v12 = vmul.f32 %v290_v11, %v290_v11 }
  0x93   : > { %v292_v13 = vsel %vm278_vm0, %v291_v12, 0.0 }
  0x94   : > { %293 = vadd.xlane.f32.xlu0 %v292_v13 }
 0x107   : > { %v294_v22 = vpop.xlane.xlu0 %293 }
 0x108   : > { %v295_v26 = vmul.f32 %v294_v22, %v1751_v8 }
 0x10a   : > { %v296_v30 = vadd.f32 1e-05, %v295_v26  ;;  %v1556_v26 = vld [vmem:[%s2018_s2 + $0x3] ss:$0 sm:$0xff] }
 0x10c   : > { %1567 = vrsqrt.f32 %v296_v30  ;;  %vm303_vm3 = vweird.f32 %v296_v30 }
 0x112   : > { %v1568_v33 = vpop.eup %1567 }
 0x113   : > { %v298_v34 = vmul.f32 %v1568_v33, %v296_v30  ;;  %vm304_vm2 = vweird.f32 %v1568_v33  ;;  %v1561_v30 = vld [vmem:[%s2018_s2 + $0x8] ss:$0 sm:$0xff] }
 0x114   : > { %vm305_vm4 = vmor %vm303_vm3, %vm304_vm2 }
 0x115   : > { %v299_v35 = vmul.f32 %v1568_v33, %v298_v34 }
 0x117   : > { %v300_v36 = vmul.f32 0.5, %v299_v35 }
 0x119   : > { %v301_v38 = vsub.f32 1.5, %v300_v36 }
 0x11b   : > { %v302_v39 = vmul.f32 %v1568_v33, %v301_v38 }
 0x11d   : > { %v306_v41 = vsel %vm305_vm4, %v1568_v33, %v302_v39  ;;  %v1562_v39 = vld [vmem:[%s2018_s2 + $0x6] ss:$0 sm:$0xff] }
 0x11e   : > { %v307_v43 = vmul.f32 %v306_v41, %v290_v11 }
 0x120   : > { %v309_v44 = vmul.f32 %v308_v40, %v307_v43  ;;  %v1563_v40 = vld [vmem:[%s2018_s2 + $0xb] ss:$0 sm:$0xff] }
 0x122   : > { %v311_v45 = vadd.f32 %v310_v42, %v309_v44 }
 0x124   : > { %v312_v46 = vpack.c.bf16 %v311_v45, %v311_v45 }
 0x126   : > { %1322 = vmatmul.msk.bf16.vlgmr.msra.gmra.mxu0 %vm278_vm0, %v312_v46  ;;  %1331 = vmatmul.msk.bf16.vlgmr.msra.gmra.mxu2 %vm278_vm0, %v312_v46 }
 0x127   : > { %1349 = vmatmul.msk.bf16.vlgmr.msra.gmra.mxu3 %vm278_vm0, %v312_v46  ;;  %1367 = vmatmul.msk.bf16.vlgmr.msra.gmra.mxu1 %vm278_vm0, %v312_v46 }
 0x128   : > { %580 = vmatpush.bf16.msra.mxu2 %v1492_v47  ;;  %630 = vmatpush.bf16.msra.mxu0 %v1496_v48  ;;  %v1559_v47 = vld [vmem:[%s2018_s2 + $0x2] ss:$0 sm:$0xff] }
 0x129   : > { %705 = vmatpush.bf16.msra.mxu3 %v1502_v49 }
 0x12c   : > { %581 = vmatpush.bf16.msra.mxu2 %v1491_v50  ;;  %631 = vmatpush.bf16.msra.mxu0 %v1495_v51 }
 0x12d   : > { %706 = vmatpush.bf16.msra.mxu3 %v1501_v52 }
 0x136   : > { %1340 = vmatmul.msk.bf16.vlgmr.msrb.gmra.mxu2 %vm278_vm0, %v312_v46  ;;  %1358 = vmatmul.msk.bf16.vlgmr.msrb.gmra.mxu0 %vm278_vm0, %v312_v46 }
 0x137   : > { %1385 = vmatmul.msk.bf16.vlgmr.msrb.gmra.mxu3 %vm278_vm0, %v312_v46  ;;  %1403 = vmatmul.msk.bf16.vlgmr.msrb.gmra.mxu1 %vm278_vm0, %v312_v46 }
 0x138   : > { %680 = vmatpush.bf16.msrb.mxu2 %v1500_v53 }
 0x13c   : > { %681 = vmatpush.bf16.msrb.mxu2 %v1499_v54 }
 0x146   : > { %1376 = vmatmul.msk.bf16.vlgmr.msra.gmra.mxu2 %vm278_vm0, %v312_v46  ;;  %1394 = vmatmul.msk.bf16.vlgmr.msra.gmra.mxu0 %vm278_vm0, %v312_v46 }
 0x147   : > { %1421 = vmatmul.msk.bf16.vlgmr.msra.gmra.mxu3 %vm278_vm0, %v312_v46 }
 0x156   : > { %1412 = vmatmul.msk.bf16.vlgmr.msrb.gmra.mxu2 %vm278_vm0, %v312_v46 }
 0x1a3   : > { %v433_v56 = vpop.f32.mrf.mxu0 }
 0x1a4   : > { %v558_v57 = vpop.f32.mrf.mxu1  ;;  %v434_v21 = vadd.f32 %v1553_v14, %v433_v56  ;;  %v1564_v56 = vld [vmem:[%s2018_s2 + $0xa] ss:$0 sm:$0xff] }
 0x1a5   : > { %v559_v58 = vadd.f32 %v1554_v55, %v558_v57 }
 0x1a6   : > { %v712_v28 = vpack.c.bf16 %v434_v21, %v434_v21 }
 0x1a7   : > { %v717_v59 = vpack.c.bf16 %v559_v58, %v559_v58 }
 0x1a9   : > { %v744_v61 = vsel %vm720_vm5, %v717_v59, 0  ;;  %v458_v62 = vpop.f32.mrf.mxu2 }
 0x1aa   : > { %v508_v63 = vpop.f32.mrf.mxu3  ;;  %753 = vmatpush.bf16.xpose.msra.mxu1 %v744_v61  ;;  %v459_v1 = vadd.f32 %v1555_v60, %v458_v62 }
 0x1ab   : > { %v435_v2 = vpop.f32.mrf.mxu0  ;;  %v509_v31 = vadd.f32 %v1556_v26, %v508_v63  ;;  %v797_v63 = vlaneseq }
 0x1ac   : > { %v560_v3 = vpop.f32.mrf.mxu1  ;;  %v713_v4 = vpack.c.bf16 %v459_v1, %v459_v1 }
 0x1ad   : > { %v715_v36 = vpack.c.bf16 %v509_v31, %v509_v31  ;;  %v798_v2 = vshrl.u32 %v797_v63, 7  ;;  %v800_v3 = vand.u32 127, %v797_v63 }
 0x1af   : > { %vm801_vm7 = vcmp.ge.s32.totalorder %v798_v2, %v800_v3  ;;  %v994_v3 = vld [vmem:[%s2019_s3 + $0x4] sm:$0xf] }
 0x1b1   : > { %1423 = vmatmul.msk.bf16.vlgmr.msra.gmra.mxu1 %vm720_vm5, %v713_v4  ;;  %v460_v6 = vpop.f32.mrf.mxu2 }
 0x1b2   : > { %v510_v9 = vpop.f32.mrf.mxu3 }
 0x1b3   : > { %v533_v10 = vpop.f32.mrf.mxu0 }
 0x1b4   : > { %v534_v11 = vadd.f32 %v1557_v5, %v533_v10  ;;  %v658_v12 = vpop.f32.mrf.mxu1 }
 0x1b5   : > { %v659_v13 = vadd.f32 %v1558_v7, %v658_v12 }
 0x1b6   : > { %v716_v15 = vpack.c.bf16 %v534_v11, %v534_v11 }
 0x1b7   : > { %v849_v16 = vpack.c.bf16 %v659_v13, %v659_v13 }
 0x1b8   : > { %v725_v18 = vsel %vm720_vm5, %v716_v15, 0 }
 0x1b9   : > { %v876_v19 = vsel %vm855_vm6, %v849_v16, 0  ;;  %v483_v20 = vpop.f32.mrf.mxu2  ;;  %734 = vmatpush.bf16.xpose.msrb.mxu0 %v725_v18 }
 0x1ba   : > { %v608_v22 = vpop.f32.mrf.mxu3  ;;  %885 = vmatpush.bf16.msrb.mxu1 %v876_v19  ;;  %v484_v52 = vadd.f32 %v1559_v47, %v483_v20 }
 0x1bb   : > { %v609_v23 = vadd.f32 %v1560_v17, %v608_v22  ;;  %v535_v24 = vpop.f32.mrf.mxu0 }
 0x1bc   : > { %v660_v25 = vpop.f32.mrf.mxu1  ;;  %v714_v55 = vpack.c.bf16 %v484_v52, %v484_v52 }
 0x1bd   : > { %v719_v27 = vpack.c.bf16 %v609_v23, %v609_v23 }
 0x1bf   : > { %v782_v29 = vsel %vm720_vm5, %v719_v27, 0 }
 0x1c0   : > { %791 = vmatpush.bf16.xpose.msrb.mxu3 %v782_v29  ;;  %1422 = vmatmul.msk.bf16.vlgmr.msrb.gmra.mxu0 %vm720_vm5, %v712_v28 }
 0x1c1   : > { %v485_v32 = vpop.f32.mrf.mxu2 }
 0x1c2   : > { %v610_v33 = vpop.f32.mrf.mxu3 }
 0x1c3   : > { %v633_v34 = vpop.f32.mrf.mxu0 }
 0x1c4   : > { %v634_v35 = vadd.f32 %v1561_v30, %v633_v34 }
 0x1c6   : > { %v848_v38 = vpack.c.bf16 %v634_v35, %v634_v35 }
 0x1c7   : > { %1425 = vmatmul.msk.bf16.vlgmr.msrb.gmra.mxu3 %vm720_vm5, %v715_v36 }
 0x1c8   : > { %v857_v41 = vsel %vm855_vm6, %v848_v38, 0 }
 0x1c9   : > { %v583_v42 = vpop.f32.mrf.mxu2  ;;  %866 = vmatpush.bf16.msra.mxu0 %v857_v41 }
 0x1ca   : > { %v584_v43 = vadd.f32 %v1562_v39, %v583_v42  ;;  %v708_v44 = vpop.f32.mrf.mxu3 }
 0x1cb   : > { %v709_v45 = vadd.f32 %v1563_v40, %v708_v44  ;;  %v635_v46 = vpop.f32.mrf.mxu0  ;;  %v993_v44 = vld [vmem:[%s2019_s3] sm:$0xf] }
 0x1cc   : > { %v718_v48 = vpack.c.bf16 %v584_v43, %v584_v43 }
 0x1cd   : > { %v851_v49 = vpack.c.bf16 %v709_v45, %v709_v45  ;;  %v1001_v45 = vsel %vm855_vm6, %v993_v44, 0 }
 0x1ce   : > { %v763_v50 = vsel %vm720_vm5, %v718_v48, 0  ;;  %1010 = vmatpush.bf16.msrb.mxu0 %v1001_v45 }
 0x1cf   : > { %v914_v51 = vsel %vm855_vm6, %v851_v49, 0  ;;  %772 = vmatpush.bf16.xpose.msra.mxu2 %v763_v50 }
 0x1d0   : > { %923 = vmatpush.bf16.msra.mxu3 %v914_v51 }
 0x1d1   : > { %v585_v53 = vpop.f32.mrf.mxu2 }
 0x1d2   : > { %v710_v54 = vpop.f32.mrf.mxu3 }
 0x1d6   : > { %1424 = vmatmul.msk.bf16.vlgmr.msra.gmra.mxu2 %vm720_vm5, %v714_v55  ;;  %v995_v55 = vld [vmem:[%s2019_s3 + $0x8] sm:$0xf] }
 0x1d9   : > { %v683_v57 = vpop.f32.mrf.mxu2 }
 0x1da   : > { %v684_v58 = vadd.f32 %v1564_v56, %v683_v57  ;;  %v1039_v57 = vsel %vm855_vm6, %v995_v55, 0 }
 0x1dc   : > { %v850_v59 = vpack.c.bf16 %v684_v58, %v684_v58 }
 0x1de   : > { %v895_v60 = vsel %vm855_vm6, %v850_v59, 0 }
 0x1df   : > { %904 = vmatpush.bf16.msrb.mxu2 %v895_v60 }
 0x1e1   : > { %v685_v61 = vpop.f32.mrf.mxu2 }
 0x1e3   : > { %1048 = vmatpush.bf16.msra.mxu2 %v1039_v57 }
 0x22e   : > { %v755_v62 = vpop.f32.mrf.mxu1 }
 0x22f   : > { %v805_v7 = vsel %vm801_vm7, %v755_v62, -1e+30 }
 0x230   : > { %v811_v10 = vsel %vm720_vm5, %v805_v7, -inf }
 0x236   : > { %v757_v1 = vpop.f32.mrf.mxu1 }
 0x237   : > { %v996_v1 = vld [vmem:[%s2019_s3 + $0xc] sm:$0xf] }
 0x238   : > { %v1058_v2 = vsel %vm855_vm6, %v996_v1, 0 }
 0x239   : > { %1067 = vmatpush.bf16.msrb.mxu3 %v1058_v2 }
 0x23d   : > { %v736_v4 = vpop.f32.mrf.mxu0 }
 0x23e   : > { %v804_v5 = vsel %vm801_vm7, %v736_v4, -1e+30  ;;  %v1020_v4 = vsel %vm855_vm6, %v994_v3, 0 }
 0x23f   : > { %v808_v6 = vsel %vm720_vm5, %v804_v5, -inf  ;;  %1029 = vmatpush.bf16.msra.mxu1 %v1020_v4 }
 0x240   : > { %809 = vmax.xlane.f32.xlu2 %v808_v6 }
 0x245   : > { %v738_v9 = vpop.f32.mrf.mxu0 }
 0x248   : > { %812 = vmax.xlane.f32.xlu2 %v811_v10 }
 0x24a   : > { %v793_v11 = vpop.f32.mrf.mxu3 }
 0x24b   : > { %v807_v16 = vsel %vm801_vm7, %v793_v11, -1e+30 }
 0x24c   : > { %v817_v18 = vsel %vm720_vm5, %v807_v16, -inf }
 0x252   : > { %v795_v12 = vpop.f32.mrf.mxu3 }
 0x259   : > { %v774_v13 = vpop.f32.mrf.mxu2 }
 0x25a   : > { %v806_v14 = vsel %vm801_vm7, %v774_v13, -1e+30 }
 0x25b   : > { %v814_v15 = vsel %vm720_vm5, %v806_v14, -inf }
 0x25c   : > { %815 = vmax.xlane.f32.xlu1 %v814_v15 }
 0x261   : > { %v776_v17 = vpop.f32.mrf.mxu2 }
 0x264   : > { %818 = vmax.xlane.f32.xlu1 %v817_v18 }
 0x2b3   : > { %v810_v19 = vpop.xlane.xlu2 %809 }
 0x2b4   : > { %v820_v20 = vsub.f32 %v804_v5, %v810_v19 }
 0x2b6   : > { %v824_v21 = vmul.f32 1.442695, %v820_v20 }
 0x2b8   : > { %1569 = vpow2.f32 %v824_v21 }
 0x2bb   : > { %v813_v22 = vpop.xlane.xlu2 %812 }
 0x2bc   : > { %v821_v23 = vsub.f32 %v805_v7, %v813_v22 }
 0x2be   : > { %v1570_v24 = vpop.eup %1569  ;;  %v826_v25 = vmul.f32 1.442695, %v821_v23 }
 0x2bf   : > { %v844_v26 = vpack.c.bf16 %v1570_v24, %v1570_v24  ;;  %v832_v27 = vsel %vm720_vm5, %v1570_v24, 0.0 }
 0x2c0   : > { %1571 = vpow2.f32 %v826_v25  ;;  %833 = vadd.xlane.f32.xlu2 %v832_v27 }
 0x2c1   : > { %1426 = vmatmul.msk.bf16.vlgmr.msra.gmra.mxu0 %vm720_vm5, %v844_v26 }
 0x2c6   : > { %v1572_v28 = vpop.eup %1571 }
 0x2c7   : > { %v845_v29 = vpack.c.bf16 %v1572_v28, %v1572_v28  ;;  %v835_v43 = vsel %vm720_vm5, %v1572_v28, 0.0 }
 0x2c9   : > { %1427 = vmatmul.msk.bf16.vlgmr.msrb.gmra.mxu1 %vm720_vm5, %v845_v29 }
 0x2cf   : > { %v816_v30 = vpop.xlane.xlu1 %815 }
 0x2d0   : > { %v822_v31 = vsub.f32 %v806_v14, %v816_v30 }
 0x2d2   : > { %v828_v32 = vmul.f32 1.442695, %v822_v31 }
 0x2d4   : > { %1573 = vpow2.f32 %v828_v32 }
 0x2d7   : > { %v819_v33 = vpop.xlane.xlu1 %818 }
 0x2d8   : > { %v823_v34 = vsub.f32 %v807_v16, %v819_v33 }
 0x2da   : > { %v1574_v35 = vpop.eup %1573  ;;  %v830_v36 = vmul.f32 1.442695, %v823_v34 }
 0x2db   : > { %v846_v38 = vpack.c.bf16 %v1574_v35, %v1574_v35  ;;  %v838_v39 = vsel %vm720_vm5, %v1574_v35, 0.0 }
 0x2dc   : > { %1575 = vpow2.f32 %v830_v36  ;;  %839 = vadd.xlane.f32.xlu0 %v838_v39 }
 0x2dd   : > { %1428 = vmatmul.msk.bf16.vlgmr.msrb.gmra.mxu2 %vm720_vm5, %v846_v38 }
 0x2e2   : > { %v1576_v40 = vpop.eup %1575 }
 0x2e3   : > { %v847_v41 = vpack.c.bf16 %v1576_v40, %v1576_v40  ;;  %v841_v42 = vsel %vm720_vm5, %v1576_v40, 0.0 }
 0x2e4   : > { %842 = vadd.xlane.f32.xlu1 %v841_v42  ;;  %836 = vadd.xlane.f32.xlu0 %v835_v43 }
 0x2e5   : > { %1429 = vmatmul.msk.bf16.vlgmr.msra.gmra.mxu3 %vm720_vm5, %v847_v41 }
 0x333   : > { %v834_v46 = vpop.xlane.xlu2 %833 }
 0x334   : > { %1577 = vrcp.f32 %v834_v46  ;;  %v940_v51 = vand.u32 2147483648, %v834_v46  ;;  %v938_v53 = vand.u32 2147483647, %v834_v46  ;;  %vm934_vm9 = vweird.f32 %v834_v46 }
 0x336   : > { %v941_v56 = vor.u32 1.1754944e-38, %v940_v51  ;;  %vm939_vm11 = vcmp.eq.f32.partialorder %v938_v53, 8.507059e+37 }
 0x33a   : > { %v1578_v47 = vpop.eup %1577 }
 0x33b   : > { %v930_v48 = vmul.f32 %v1578_v47, %v834_v46  ;;  %vm935_vm8 = vweird.f32 %v1578_v47 }
 0x33c   : > { %vm936_vm10 = vmor %vm934_vm9, %vm935_vm8 }
 0x33d   : > { %v931_v49 = vsub.f32 1.0, %v930_v48 }
 0x33e   : > { %v868_v50 = vpop.f32.mrf.mxu0 }
 0x33f   : > { %v932_v52 = vmul.f32 %v1578_v47, %v931_v49 }
 0x341   : > { %v933_v54 = vadd.f32 %v1578_v47, %v932_v52 }
 0x343   : > { %v937_v58 = vsel %vm936_vm10, %v1578_v47, %v933_v54 }
 0x344   : > { %v942_v59 = vsel %vm939_vm11, %v941_v56, %v937_v58 }
 0x345   : > { %v985_v60 = vmul.f32 %v942_v59, %v868_v50 }
 0x346   : > { %v870_v61 = vpop.f32.mrf.mxu0  ;;  %v1916_v62 = vpop.f32.mrf.mxu1 }
 0x347   : > { %v989_v63 = vpack.c.bf16 %v985_v60, %v985_v60 }
 0x349   : > { %1430 = vmatmul.msk.bf16.vlgmr.msrb.gmra.mxu0 %vm720_vm5, %v989_v63 }
 0x34e   : > { %v889_v5 = vpop.f32.mrf.mxu1 }
 0x34f   : > { %v840_v6 = vpop.xlane.xlu0 %839 }
 0x350   : > { %1579 = vrcp.f32 %v840_v6  ;;  %v968_v13 = vand.u32 2147483648, %v840_v6  ;;  %v966_v15 = vand.u32 2147483647, %v840_v6  ;;  %vm962_vm13 = vweird.f32 %v840_v6 }
 0x352   : > { %v969_v18 = vor.u32 1.1754944e-38, %v968_v13  ;;  %vm967_vm15 = vcmp.eq.f32.partialorder %v966_v15, 8.507059e+37  ;;  %v1504_v13 = vld [vmem:[%s2020_s4 + $0x8] sm:$0xff] }
 0x353   : > { %1136 = vmatpush.bf16.msra.mxu0 %v1504_v13 }
 0x356   : > { %v1580_v7 = vpop.eup %1579 }
 0x357   : > { %v958_v9 = vmul.f32 %v1580_v7, %v840_v6  ;;  %v843_v10 = vpop.xlane.xlu1 %842  ;;  %v837_v11 = vpop.xlane.xlu0 %836  ;;  %vm963_vm12 = vweird.f32 %v1580_v7 }
 0x358   : > { %1581 = vrcp.f32 %v843_v10  ;;  %vm964_vm14 = vmor %vm962_vm13, %vm963_vm12  ;;  %v954_v28 = vand.u32 2147483648, %v837_v11  ;;  %v982_v29 = vand.u32 2147483648, %v843_v10  ;;  %v980_v32 = vand.u32 2147483647, %v843_v10 }
 0x359   : > { %v959_v12 = vsub.f32 1.0, %v958_v9  ;;  %1583 = vrcp.f32 %v837_v11  ;;  %v952_v34 = vand.u32 2147483647, %v837_v11  ;;  %vm976_vm3 = vweird.f32 %v843_v10 }
 0x35a   : > { %vm948_vm4 = vweird.f32 %v837_v11  ;;  %v983_v38 = vor.u32 1.1754944e-38, %v982_v29  ;;  %v955_v39 = vor.u32 1.1754944e-38, %v954_v28  ;;  %vm981_vm8 = vcmp.eq.f32.partialorder %v980_v32, 8.507059e+37  ;;  %v1509_v32 = vld [vmem:[%s2021_s5 + $0x20] sm:$0xff] }
 0x35b   : > { %v960_v14 = vmul.f32 %v1580_v7, %v959_v12  ;;  %vm953_vm9 = vcmp.eq.f32.partialorder %v952_v34, 8.507059e+37  ;;  %v1507_v34 = vld [vmem:[%s2021_s5 + $0x10] sm:$0xff] }
 0x35d   : > { %v961_v16 = vadd.f32 %v1580_v7, %v960_v14  ;;  %v1512_v14 = vld [vmem:[%s2021_s5 + $0x38] sm:$0xff] }
 0x35e   : > { %v1582_v17 = vpop.eup %1581  ;;  %1218 = vmatpush.bf16.msrb.mxu1 %v1512_v14 }
 0x35f   : > { %v1584_v19 = vpop.eup %1583  ;;  %v972_v20 = vmul.f32 %v1582_v17, %v843_v10  ;;  %v965_v21 = vsel %vm964_vm14, %v1580_v7, %v961_v16  ;;  %vm977_vm1 = vweird.f32 %v1582_v17 }
 0x360   : > { %v944_v22 = vmul.f32 %v1584_v19, %v837_v11  ;;  %v906_v23 = vpop.f32.mrf.mxu2  ;;  %v970_v24 = vsel %vm967_vm15, %v969_v18, %v965_v21  ;;  %vm949_vm2 = vweird.f32 %v1584_v19  ;;  %vm978_vm6 = vmor %vm976_vm3, %vm977_vm1 }
 0x361   : > { %v973_v25 = vsub.f32 1.0, %v972_v20  ;;  %v987_v26 = vmul.f32 %v970_v24, %v906_v23  ;;  %vm950_vm7 = vmor %vm948_vm4, %vm949_vm2 }
 0x362   : > { %v945_v27 = vsub.f32 1.0, %v944_v22 }
 0x363   : > { %v991_v30 = vpack.c.bf16 %v987_v26, %v987_v26  ;;  %v974_v31 = vmul.f32 %v1582_v17, %v973_v25  ;;  %v1105_v25 = vperm.slane %v1808_v37, 3 }
 0x364   : > { %v946_v33 = vmul.f32 %v1584_v19, %v945_v27  ;;  %v1107_v27 = vperm.slane %v1808_v37, 4 }
 0x365   : > { %1432 = vmatmul.msk.bf16.vlgmr.msra.gmra.mxu2 %vm720_vm5, %v991_v30  ;;  %v975_v35 = vadd.f32 %v1582_v17, %v974_v31  ;;  %v1510_v31 = vld [vmem:[%s2021_s5 + $0x28] sm:$0xff] }
 0x366   : > { %v947_v36 = vadd.f32 %v1584_v19, %v946_v33  ;;  %v1508_v33 = vld [vmem:[%s2021_s5 + $0x18] sm:$0xff] }
 0x367   : > { %v979_v40 = vsel %vm978_vm6, %v1582_v17, %v975_v35  ;;  %v1511_v17 = vld [vmem:[%s2021_s5 + $0x30] sm:$0xff]  ;;  %v1506_v35 = vld [vmem:[%s2021_s5 + $0x8] sm:$0xff] }
 0x368   : > { %v951_v41 = vsel %vm950_vm7, %v1584_v19, %v947_v36  ;;  %v908_v42 = vpop.f32.mrf.mxu2  ;;  %v925_v43 = vpop.f32.mrf.mxu3  ;;  %v984_v44 = vsel %vm981_vm8, %v983_v38, %v979_v40  ;;  %1219 = vmatpush.bf16.msrb.mxu1 %v1511_v17  ;;  %v1505_v36 = vld [vmem:[%s2021_s5] sm:$0xff]  ;;  %v277_v38 = vld [vmem:[%s2022_s6 + $0x8] sm:$0xff] }
 0x369   : > { %v956_v45 = vsel %vm953_vm9, %v955_v39, %v951_v41  ;;  %v988_v46 = vmul.f32 %v984_v44, %v925_v43  ;;  %v1114_v39 = vperm.slane %v277_v38, 0 }
 0x36a   : > { %v986_v47 = vmul.f32 %v956_v45, %v1916_v62  ;;  %v1080_v62 = vperm.slane %v1808_v37, 2 }
 0x36b   : > { %v992_v48 = vpack.c.bf16 %v988_v46, %v988_v46 }
 0x36c   : > { %v990_v49 = vpack.c.bf16 %v986_v47, %v986_v47  ;;  %1220 = vmatpush.bf16.msrb.mxu1 %v1510_v31 }
 0x36d   : > { %1433 = vmatmul.msk.bf16.vlgmr.msrb.gmra.mxu3 %vm720_vm5, %v992_v48 }
 0x36e   : > { %1431 = vmatmul.msk.bf16.vlgmr.msra.gmra.mxu1 %vm720_vm5, %v990_v49 }
 0x370   : > { %v927_v50 = vpop.f32.mrf.mxu3  ;;  %1221 = vmatpush.bf16.msrb.mxu1 %v1509_v32 }
 0x374   : > { %1222 = vmatpush.bf16.msrb.mxu1 %v1508_v33 }
 0x378   : > { %1223 = vmatpush.bf16.msrb.mxu1 %v1507_v34 }
 0x37c   : > { %1224 = vmatpush.bf16.msrb.mxu1 %v1506_v35 }
 0x380   : > { %1225 = vmatpush.bf16.msrb.mxu1 %v1505_v36 }
 0x3c6   : > { %v1012_v51 = vpop.f32.mrf.mxu0 }
 0x3c7   : > { %v1073_v55 = vsel %vm278_vm0, %v1012_v51, 0.0 }
 0x3ce   : > { %v1014_v52 = vpop.f32.mrf.mxu0 }
 0x3e8   : > { %v1050_v53 = vpop.f32.mrf.mxu2 }
 0x3e9   : > { %v1076_v58 = vsel %vm278_vm0, %v1050_v53, 0.0  ;;  %v1169_v53 = vperm.slane %v1808_v37, 5 }
 0x3eb   : > { %v1031_v54 = vpop.f32.mrf.mxu1 }
 0x3ec   : > { %v1074_v56 = vsel %vm278_vm0, %v1031_v54, 0.0 }
 0x3ed   : > { %v1075_v57 = vadd.f32 %v1074_v56, %v1073_v55 }
 0x3ef   : > { %v1077_v61 = vadd.f32 %v1076_v58, %v1075_v57 }
 0x3f0   : > { %v1052_v59 = vpop.f32.mrf.mxu2  ;;  %v1069_v60 = vpop.f32.mrf.mxu3 }
 0x3f1   : > { %v1078_v63 = vsel %vm278_vm0, %v1069_v60, 0.0 }
 0x3f2   : > { %v1079_v1 = vadd.f32 %v1078_v63, %v1077_v61 }
 0x3f3   : > { %v1033_v2 = vpop.f32.mrf.mxu1 }
 0x3f4   : > { %v1081_v3 = vadd.f32 %v1080_v62, %v1079_v1 }
 0x3f6   : > { %v1937_v4 = vadd.f32 %v1081_v3, %v1747_v0  ;;  %v1503_v0 = vld [vmem:[%s2020_s4] sm:$0xff] }
 0x3f7   : > { %1137 = vmatpush.bf16.msra.mxu0 %v1503_v0 }
 0x3f8   : > { %v1071_v5 = vpop.f32.mrf.mxu3  ;;  %v1083_v6 = vsel %vm278_vm0, %v1937_v4, 0.0 }
 0x3f9   : > { %1084 = vadd.xlane.f32.xlu1 %v1083_v6 }
 0x46c   : > { %v1085_v7 = vpop.xlane.xlu1 %1084 }
 0x46d   : > { %v1086_v9 = vmul.f32 %v1085_v7, %v1751_v8 }
 0x46f   : > { %v1087_v10 = vsub.f32 %v1937_v4, %v1086_v9 }
 0x471   : > { %v1088_v11 = vmul.f32 %v1087_v10, %v1087_v10 }
 0x473   : > { %v1089_v12 = vsel %vm278_vm0, %v1088_v11, 0.0 }
 0x474   : > { %1090 = vadd.xlane.f32.xlu2 %v1089_v12 }
 0x4e7   : > { %v1091_v15 = vpop.xlane.xlu2 %1090 }
 0x4e8   : > { %v1092_v16 = vmul.f32 %v1091_v15, %v1751_v8 }
 0x4ea   : > { %v1093_v18 = vadd.f32 1e-05, %v1092_v16 }
 0x4ec   : > { %1585 = vrsqrt.f32 %v1093_v18  ;;  %vm1100_vm10 = vweird.f32 %v1093_v18 }
 0x4f2   : > { %v1586_v19 = vpop.eup %1585 }
 0x4f3   : > { %v1095_v20 = vmul.f32 %v1586_v19, %v1093_v18  ;;  %vm1101_vm5 = vweird.f32 %v1586_v19 }
 0x4f4   : > { %vm1102_vm11 = vmor %vm1100_vm10, %vm1101_vm5 }
 0x4f5   : > { %v1096_v21 = vmul.f32 %v1586_v19, %v1095_v20 }
 0x4f7   : > { %v1097_v22 = vmul.f32 0.5, %v1096_v21 }
 0x4f9   : > { %v1098_v23 = vsub.f32 1.5, %v1097_v22 }
 0x4fb   : > { %v1099_v24 = vmul.f32 %v1586_v19, %v1098_v23 }
 0x4fd   : > { %v1103_v8 = vsel %vm1102_vm11, %v1586_v19, %v1099_v24 }
 0x4fe   : > { %v1104_v26 = vmul.f32 %v1103_v8, %v1087_v10 }
 0x500   : > { %v1106_v28 = vmul.f32 %v1105_v25, %v1104_v26 }
 0x502   : > { %v1108_v29 = vadd.f32 %v1107_v27, %v1106_v28 }
 0x504   : > { %v1109_v30 = vpack.c.bf16 %v1108_v29, %v1108_v29 }
 0x506   : > { %1442 = vmatmul.msk.bf16.vlgmr.msra.gmra.mxu0 %vm278_vm0, %v1109_v30 }
 0x583   : > { %v1139_v40 = vpop.f32.mrf.mxu0 }
 0x584   : > { %v1140_v41 = vadd.f32 %v1139_v40, %v1114_v39 }
 0x586   : > { %v1144_v42 = vmul.f32 0.044715, %v1140_v41  ;;  %v1143_v49 = vmul.f32 0.5, %v1140_v41 }
 0x588   : > { %v1145_v43 = vmul.f32 %v1144_v42, %v1140_v41 }
 0x58a   : > { %v1146_v44 = vmul.f32 %v1145_v43, %v1140_v41 }
 0x58b   : > { %v1141_v45 = vpop.f32.mrf.mxu0 }
 0x58c   : > { %v1147_v46 = vadd.f32 %v1146_v44, %v1140_v41 }
 0x58e   : > { %v1148_v47 = vmul.f32 0.7978846, %v1147_v46 }
 0x590   : > { %1587 = vtanh.f32 %v1148_v47 }
 0x596   : > { %v1588_v48 = vpop.eup %1587 }
 0x597   : > { %v1150_v50 = vadd.f32 1.0, %v1588_v48 }
 0x599   : > { %v1151_v51 = vmul.f32 %v1150_v50, %v1143_v49 }
 0x59b   : > { %v1152_v52 = vpack.c.bf16 %v1151_v51, %v1151_v51 }
 0x59d   : > { %1226 = vmatmul.bf16.vlgmr.msrb.gmra.mxu1 %v1152_v52 }
 0x61a   : > { %v1227_v54 = vpop.f32.mrf.mxu1 }
 0x61b   : > { %v1228_v55 = vadd.f32 %v1227_v54, %v1169_v53 }
 0x61d   : > { %v1231_v56 = vadd.f32 %v1228_v55, %v1937_v4 }
 0x61f   : > { %1232 = vst.msk [vmem:[%s269_s16] sm:$0xff] %vm278_vm0, %v1231_v56 }
 0x620   : > { %1616 = shalt.err (!%p1613_p3)
}
 0x621   : > { %1513 = dma.vmem_to_hbm [thread:$0]  (%p1732_p5), %s1247_s17, 128, %s1249_s18, %s1234_s19  }
 0x622   : > { %v1229_v37 = vpop.f32.mrf.mxu1 }
 0x623 PF: > { %p1519_p4 = scmp.ge.s32.totalorder %s1651_s27, 2  ;;  %s1260_s29 = sand.u32 1, %s1639_s24  }
 0x624   : > { %s1261_s13 = scalar_lea.sflag [#allocation3], %s1260_s29 }
 0x625   : > { %p1516_p7 = pnand %p1519_p4, %p1736_p6 }
 0x627   : > { %p1517_p8 = pneg %p1516_p7 }
 0x629   : > { %1634 = dma.done.wait (%p1517_p8), %s1261_s13, 128  }
 0x62a   : > { %1636 = vsyncadd (%p1517_p8), %s1261_s13, 4294967168  ;;  %p17_p9 = scmp.ge.s32.totalorder %s1719_s30, 4   ;;  %s2026_s24 = smov %s1643_s25 }
 0x62b   : > { %s2027_s25 = smov %s1647_s26  ;;  %s2028_s26 = smov %s1730_s10 }
 0x62c   : > { %s2029_s27 = smov %s1719_s30  ;;  %19 = sbr.rel (!%p17_p9) target bundleno = 3 (0x3), region = 83 }
 0x631   :  { %1267 = vsyncpa [#allocation3], 1 }
 0x632   :  { %1269 = vsyncpa [#allocation3 + $0x1], 1 }

</bundles_post_ra>
